<compile_context>
chip_gen: v7x
topology: tpu7x:2x2x1
jax: 0.10.0
libtpu: 0.0.40
codegen_flags: <defaults>
</compile_context>

<pallas_src>
import math
from functools import partial

import jax
import jax.numpy as jnp
from jax import lax
from jax.experimental import pallas as pl
from jax.experimental.pallas import tpu as pltpu

_NEG_INF = -1000000000.0
_LN_EPS = 1e-5


def _layer_norm(h, gamma, beta):
    # Centered (two-pass) variance for numerical robustness; rsqrt on the EUP.
    mu = jnp.mean(h, axis=-1, keepdims=True)
    d = h - mu
    var = jnp.mean(d * d, axis=-1, keepdims=True)
    return d * lax.rsqrt(var + _LN_EPS) * gamma + beta


def encoder_kernel(x_ref, bias_ref,
                   wqkv_ref, bqkv_ref, wo_ref, bo_ref,
                   w1_ref, b1_ref, w2_ref, b2_ref,
                   g1_ref, be1_ref, g2_ref, be2_ref,
                   out_ref, *, num_heads):
    f32 = jnp.float32
    cdt = wqkv_ref.dtype               # MXU input dtype (bf16 on the fast path)
    S, D = x_ref.shape[1], x_ref.shape[2]
    H = num_heads
    kd = D // H

    xv = x_ref[0]
    x_f = xv.astype(f32)                                   # (S, D) residual path (f32)

    # --- fused lane-dense QKV projection (computed transposed so the head split is a
    # --- leading-dim-only reshape).  Scale 1/sqrt(kd) is already folded into Wq/bq.
    xT = jnp.transpose(x_f).astype(cdt)                    # (D, S)
    qkvT = jnp.dot(wqkv_ref[...], xT,
                   preferred_element_type=f32) + bqkv_ref[...]      # (3D, S) f32
    qkvT = qkvT.reshape(3 * H, kd, S)                      # leading split only

    qh = jnp.transpose(qkvT[0:H], (0, 2, 1)).astype(cdt)   # (H, S, kd)
    kT = qkvT[H:2 * H].astype(cdt)                         # (H, kd, S)  (== K^T per head)
    vT = qkvT[2 * H:].astype(cdt)                          # (H, kd, S)

    # --- attention scores for all heads in one batched contraction -> (H, S, S)
    scores = jnp.einsum('hqc,hct->hqt', qh, kT, preferred_element_type=f32)

    # --- masking: precomputed additive bias (Mq, S); single add over the scores.
    scores = scores + jnp.broadcast_to(bias_ref[0], scores.shape)

    # --- numerically stable softmax (exp on EUP, approx reciprocal on EUP).
    m = jnp.max(scores, axis=-1, keepdims=True)
    e = jnp.exp(scores - m)
    probs = (e * pl.reciprocal(jnp.sum(e, axis=-1, keepdims=True),
                               approx=True)).astype(cdt)

    # --- probs @ V, batched over heads, produced head-transposed -> (H, kd, S)
    attnT = jnp.einsum('hjt,hqt->hjq', vT, probs, preferred_element_type=f32)

    # --- combine heads (leading-dim merge + 2D transpose) and fold the head reduction
    # --- into the output-projection contraction: (S, D) @ (D, D).
    attn_sd = jnp.transpose(attnT.reshape(D, S)).astype(cdt)          # (S, D)
    attn_out = jnp.dot(attn_sd, wo_ref[...],
                       preferred_element_type=f32) + bo_ref[...]      # (S, D) f32

    # --- residual + LayerNorm 1 (dropout == identity in eval mode)
    h1 = _layer_norm(x_f + attn_out, g1_ref[...], be1_ref[...])

    # --- position-wise feed-forward (bf16 MXU inputs, f32 accumulation)
    f = jnp.dot(h1.astype(cdt), w1_ref[...], preferred_element_type=f32) + b1_ref[...]
    f = jnp.maximum(f, 0.0)
    f = jnp.dot(f.astype(cdt), w2_ref[...], preferred_element_type=f32) + b2_ref[...]

    # --- residual + LayerNorm 2
    out_ref[0] = _layer_norm(h1 + f, g2_ref[...], be2_ref[...]).astype(out_ref.dtype)


def _vmem_limit_bytes():
    # Generation-aware VMEM budget: ~75% of physical per-TC VMEM (64 MiB on v7x,
    # 128 MiB on v5e/v6e), with a conservative fallback.
    try:
        cap = int(pltpu.get_tpu_info().vmem_capacity_bytes)
    except Exception:
        cap = 64 * 1024 * 1024
    return max(32 * 1024 * 1024, (cap * 3) // 4)


def encoder_forward(x, mask, params, *, num_heads, compute_dtype=jnp.bfloat16):
    """Fused Encoder forward.

    x:    (B, S, D) activations.
    mask: (B, S), (B, 1, S) or (B, S, S); 0 == masked (PyTorch masked_fill semantics).
    params: Linear weights pre-transposed to (in_features, out_features) + LN params.
    """
    B, S, D = x.shape
    assert D % num_heads == 0, (D, num_heads)
    kd = D // num_heads
    Hid = params["w1"].shape[1]

    # Guard against PyTorch-layout (out, in) weights being passed by mistake.
    assert params["wq"].shape == (D, D) and params["wk"].shape == (D, D)
    assert params["wv"].shape == (D, D) and params["wo"].shape == (D, D)
    assert params["w1"].shape == (D, Hid) and params["w2"].shape == (Hid, D)

    f32 = jnp.float32
    cdt = compute_dtype
    scale = 1.0 / math.sqrt(kd)

    # Fused QKV weight, output-major (3D, D); 1/sqrt(kd) folded into the Q slice.
    wqkvT = jnp.concatenate(
        [params["wq"] * scale, params["wk"], params["wv"]], axis=1).T.astype(cdt)
    bqkvT = jnp.concatenate(
        [params["bq"].reshape(-1) * scale,
         params["bk"].reshape(-1),
         params["bv"].reshape(-1)]).reshape(3 * D, 1).astype(f32)

    wo = params["wo"].astype(cdt)
    bo = params["bo"].reshape(1, D).astype(f32)
    w1 = params["w1"].astype(cdt)
    w2 = params["w2"].astype(cdt)
    b1 = params["b1"].reshape(1, Hid).astype(f32)
    b2 = params["b2"].reshape(1, D).astype(f32)
    g1 = params["g1"].reshape(1, D).astype(f32)
    be1 = params["be1"].reshape(1, D).astype(f32)
    g2 = params["g2"].reshape(1, D).astype(f32)
    be2 = params["be2"].reshape(1, D).astype(f32)

    # Additive mask bias: 0 where kept, -1e9 where masked; small (B, Mq, S) slab.
    if mask.ndim == 2:
        mask = mask[:, None, :]
    assert mask.shape[0] == B and mask.shape[-1] == S
    Mq = mask.shape[1]
    bias = jnp.where(mask == 0, _NEG_INF, 0.0).astype(f32)

    def rep(a):
        nd = a.ndim
        # Whole-array block, constant index -> fetched once, stays VMEM-resident.
        return pl.BlockSpec(a.shape, lambda b, _nd=nd: (0,) * _nd)

    in_specs = [
        pl.BlockSpec((1, S, D), lambda b: (b, 0, 0)),    # x
        pl.BlockSpec((1, Mq, S), lambda b: (b, 0, 0)),   # additive mask bias
        rep(wqkvT), rep(bqkvT), rep(wo), rep(bo),
        rep(w1), rep(b1), rep(w2), rep(b2),
        rep(g1), rep(be1), rep(g2), rep(be2),
    ]

    def nbytes(a):
        return a.size * a.dtype.itemsize

    weight_bytes = sum(nbytes(a) for a in (wqkvT, bqkvT, wo, bo, w1, b1, w2, b2,
                                           g1, be1, g2, be2))
    cost = pl.CostEstimate(
        flops=int(B * (8 * S * D * D + 4 * S * S * D + 4 * S * D * Hid)),
        transcendentals=int(B * num_heads * S * S),
        bytes_accessed=int(weight_bytes + 2 * B * S * D * x.dtype.itemsize
                           + B * Mq * S * 4),
    )

    return pl.pallas_call(
        partial(encoder_kernel, num_heads=num_heads),
        out_shape=jax.ShapeDtypeStruct((B, S, D), x.dtype),
        grid_spec=pltpu.PrefetchScalarGridSpec(
            num_scalar_prefetch=0,
            grid=(B,),
            in_specs=in_specs,
            out_specs=pl.BlockSpec((1, S, D), lambda b: (b, 0, 0)),
        ),
        compiler_params=pltpu.CompilerParams(
            dimension_semantics=("parallel",),
            vmem_limit_bytes=_vmem_limit_bytes(),
        ),
        cost_estimate=cost,
    )(
        x, bias,
        wqkvT, bqkvT, wo, bo,
        w1, b1, w2, b2,
        g1, be1, g2, be2,
    )


# ---------------------------------------------------------------------------
# Pure-JAX reference (mirrors the PyTorch forward) for a correctness check.
# ---------------------------------------------------------------------------
def encoder_reference(x, mask, params, *, num_heads):
    B, S, D = x.shape
    kd = D // num_heads

    def lin(h, w, b):
        return h @ w + b.reshape(-1)

    q = lin(x, params["wq"], params["bq"]).reshape(B, S, num_heads, kd).transpose(0, 2, 1, 3)
    k = lin(x, params["wk"], params["bk"]).reshape(B, S, num_heads, kd).transpose(0, 2, 1, 3)
    v = lin(x, params["wv"], params["bv"]).reshape(B, S, num_heads, kd).transpose(0, 2, 1, 3)
    scores = jnp.einsum("bhqd,bhkd->bhqk", q, k) / math.sqrt(kd)
    m = mask if mask.ndim == 3 else mask[:, None, :]
    scores = jnp.where(m[:, None] == 0, _NEG_INF, scores)
    probs = jax.nn.softmax(scores, axis=-1)
    attn = jnp.einsum("bhqk,bhkd->bhqd", probs, v).transpose(0, 2, 1, 3).reshape(B, S, D)
    attn = lin(attn, params["wo"], params["bo"])

    def layer_norm(h, g, b):
        mu = jnp.mean(h, axis=-1, keepdims=True)
        var = jnp.mean(jnp.square(h - mu), axis=-1, keepdims=True)
        return (h - mu) / jnp.sqrt(var + _LN_EPS) * g.reshape(-1) + b.reshape(-1)

    h1 = layer_norm(x + attn, params["g1"], params["be1"])
    f = jnp.maximum(lin(h1, params["w1"], params["b1"]), 0.0)
    f = lin(f, params["w2"], params["b2"])
    return layer_norm(h1 + f, params["g2"], params["be2"])


if __name__ == "__main__":
    # Small shapes consistent with the module: B=2, S=8, D=32, heads=4, hidden=64.
    # (Note: far below native (8,128) tiles / MXU width -- correctness check only;
    #  benchmark with S, D >= 128 to see the fused-matmul / masking improvements.)
    B, S, D, NUM_HEADS, HIDDEN = 2, 8, 32, 4, 64

    key = jax.random.PRNGKey(0)
    ks = jax.random.split(key, 16)

    def init_w(k, shape, fan_in):
        bound = 1.0 / math.sqrt(fan_in)
        return jax.random.uniform(k, shape, jnp.float32, -bound, bound)

    params = {
        "wq": init_w(ks[0], (D, D), D), "bq": init_w(ks[1], (1, D), D),
        "wk": init_w(ks[2], (D, D), D), "bk": init_w(ks[3], (1, D), D),
        "wv": init_w(ks[4], (D, D), D), "bv": init_w(ks[5], (1, D), D),
        "wo": init_w(ks[6], (D, D), D), "bo": init_w(ks[7], (1, D), D),
        "w1": init_w(ks[8], (D, HIDDEN), D), "b1": init_w(ks[9], (1, HIDDEN), D),
        "w2": init_w(ks[10], (HIDDEN, D), HIDDEN), "b2": init_w(ks[11], (1, D), HIDDEN),
        "g1": jnp.ones((1, D), jnp.float32), "be1": jnp.zeros((1, D), jnp.float32),
        "g2": jnp.ones((1, D), jnp.float32), "be2": jnp.zeros((1, D), jnp.float32),
    }

    x = jax.random.normal(ks[12], (B, S, D), jnp.float32)
    # Key-padding mask (B, 1, S): last two sequence positions of batch 1 masked.
    keep = jnp.ones((B, S), jnp.float32).at[1, -2:].set(0.0)
    mask = keep[:, None, :]

    ref = encoder_reference(x, mask, params, num_heads=NUM_HEADS)

    # f32 compute path: tight check of the kernel math (approx recip/rsqrt only).
    out_f32 = jax.block_until_ready(
        encoder_forward(x, mask, params, num_heads=NUM_HEADS,
                        compute_dtype=jnp.float32))
    assert jnp.allclose(out_f32, ref, atol=1e-2, rtol=1e-2), (
        f"f32 max abs err {jnp.max(jnp.abs(out_f32 - ref))}")

    # Optimized default: bf16 MXU inputs, f32 accumulation.
    out = jax.block_until_ready(
        encoder_forward(x, mask, params, num_heads=NUM_HEADS))
    assert jnp.allclose(out, ref, atol=7e-2, rtol=7e-2), (
        f"bf16 max abs err {jnp.max(jnp.abs(out - ref))}")

    print("KERNEL_OK")
</pallas_src>

<mosaic_0001>
module attributes {stable_mosaic.version = 11 : i64} {
  func.func @encoder_kernel(%arg0: i32, %arg1: memref<1x8x32xf32, #tpu.memory_space<vmem>>, %arg2: memref<1x1x8xf32, #tpu.memory_space<vmem>>, %arg3: memref<96x32xf32, #tpu.memory_space<vmem>>, %arg4: memref<96x1xf32, #tpu.memory_space<vmem>>, %arg5: memref<32x32xf32, #tpu.memory_space<vmem>>, %arg6: memref<1x32xf32, #tpu.memory_space<vmem>>, %arg7: memref<32x64xf32, #tpu.memory_space<vmem>>, %arg8: memref<1x64xf32, #tpu.memory_space<vmem>>, %arg9: memref<64x32xf32, #tpu.memory_space<vmem>>, %arg10: memref<1x32xf32, #tpu.memory_space<vmem>>, %arg11: memref<1x32xf32, #tpu.memory_space<vmem>>, %arg12: memref<1x32xf32, #tpu.memory_space<vmem>>, %arg13: memref<1x32xf32, #tpu.memory_space<vmem>>, %arg14: memref<1x32xf32, #tpu.memory_space<vmem>>, %arg15: memref<1x8x32xf32, #tpu.memory_space<vmem>>) attributes {dimension_semantics = [#tpu.dimension_semantics<parallel>], iteration_bounds = array<i64: 2>, scalar_prefetch = 0 : i64, scratch_operands = 0 : i64, tpu.core_type = #tpu.core_type<tc>, window_params = [{transform_indices = @transform_0, window_bounds = array<i64: 1, 8, 32>}, {transform_indices = @transform_1, window_bounds = array<i64: 1, 1, 8>}, {pipeline_mode = #tpu.pipeline_mode<synchronous>, transform_indices = @transform_2, window_bounds = array<i64: 96, 32>}, {pipeline_mode = #tpu.pipeline_mode<synchronous>, transform_indices = @transform_3, window_bounds = array<i64: 96, 1>}, {pipeline_mode = #tpu.pipeline_mode<synchronous>, transform_indices = @transform_4, window_bounds = array<i64: 32, 32>}, {pipeline_mode = #tpu.pipeline_mode<synchronous>, transform_indices = @transform_5, window_bounds = array<i64: 1, 32>}, {pipeline_mode = #tpu.pipeline_mode<synchronous>, transform_indices = @transform_6, window_bounds = array<i64: 32, 64>}, {pipeline_mode = #tpu.pipeline_mode<synchronous>, transform_indices = @transform_7, window_bounds = array<i64: 1, 64>}, {pipeline_mode = #tpu.pipeline_mode<synchronous>, transform_indices = @transform_8, window_bounds = array<i64: 64, 32>}, {pipeline_mode = #tpu.pipeline_mode<synchronous>, transform_indices = @transform_9, window_bounds = array<i64: 1, 32>}, {pipeline_mode = #tpu.pipeline_mode<synchronous>, transform_indices = @transform_10, window_bounds = array<i64: 1, 32>}, {pipeline_mode = #tpu.pipeline_mode<synchronous>, transform_indices = @transform_11, window_bounds = array<i64: 1, 32>}, {pipeline_mode = #tpu.pipeline_mode<synchronous>, transform_indices = @transform_12, window_bounds = array<i64: 1, 32>}, {pipeline_mode = #tpu.pipeline_mode<synchronous>, transform_indices = @transform_13, window_bounds = array<i64: 1, 32>}, {transform_indices = @transform_14, window_bounds = array<i64: 1, 8, 32>}]} {
    %c0 = arith.constant 0 : index
    %c0_0 = arith.constant 0 : index
    %c0_1 = arith.constant 0 : index
    %0 = vector.load %arg1[%c0, %c0_0, %c0_1] : memref<1x8x32xf32, #tpu.memory_space<vmem>>, vector<1x8x32xf32>
    %1 = vector.shape_cast %0 : vector<1x8x32xf32> to vector<8x32xf32>
    %2 = tpu.transpose %1, [1, 0] : vector<8x32xf32> -> vector<32x8xf32>
    %c0_2 = arith.constant 0 : index
    %c0_3 = arith.constant 0 : index
    %3 = vector.load %arg3[%c0_2, %c0_3] : memref<96x32xf32, #tpu.memory_space<vmem>>, vector<96x32xf32>
    %cst = arith.constant dense<0.000000e+00> : vector<96x8xf32>
    %4 = tpu.matmul %3, %2, %cst {dimension_numbers = #tpu.dot_dimension_numbers<[1], [0], [0], [1], [0, 0, 1, 1], [], []>} : vector<96x32xf32>, vector<32x8xf32>, vector<96x8xf32> -> vector<96x8xf32>
    %c0_4 = arith.constant 0 : index
    %c0_5 = arith.constant 0 : index
    %5 = vector.load %arg4[%c0_4, %c0_5] : memref<96x1xf32, #tpu.memory_space<vmem>>, vector<96x1xf32>
    %6 = vector.broadcast %5 : vector<96x1xf32> to vector<96x8xf32>
    %7 = arith.addf %4, %6 : vector<96x8xf32>
    %8 = vector.shape_cast %7 : vector<96x8xf32> to vector<12x8x8xf32>
    %9 = vector.extract_strided_slice %8 {offsets = [0, 0, 0], sizes = [4, 8, 8], strides = [1, 1, 1]} : vector<12x8x8xf32> to vector<4x8x8xf32>
    %10 = tpu.transpose %9, [0, 2, 1] : vector<4x8x8xf32> -> vector<4x8x8xf32>
    %11 = vector.extract_strided_slice %8 {offsets = [4, 0, 0], sizes = [4, 8, 8], strides = [1, 1, 1]} : vector<12x8x8xf32> to vector<4x8x8xf32>
    %12 = vector.extract_strided_slice %8 {offsets = [8, 0, 0], sizes = [4, 8, 8], strides = [1, 1, 1]} : vector<12x8x8xf32> to vector<4x8x8xf32>
    "tpu.trace_start"() <{level = 10 : i32, message = "hqc,hct->hqt"}> : () -> ()
    %cst_6 = arith.constant dense<0.000000e+00> : vector<4x8x8xf32>
    %13 = tpu.matmul %10, %11, %cst_6 {dimension_numbers = #tpu.dot_dimension_numbers<[2], [1], [1], [2], [0, 0, 0, 1, 1, 2], [0], [0]>} : vector<4x8x8xf32>, vector<4x8x8xf32>, vector<4x8x8xf32> -> vector<4x8x8xf32>
    "tpu.trace_stop"() : () -> ()
    %c0_7 = arith.constant 0 : index
    %c0_8 = arith.constant 0 : index
    %c0_9 = arith.constant 0 : index
    %14 = vector.load %arg2[%c0_7, %c0_8, %c0_9] : memref<1x1x8xf32, #tpu.memory_space<vmem>>, vector<1x1x8xf32>
    %15 = vector.shape_cast %14 : vector<1x1x8xf32> to vector<1x8xf32>
    %16 = vector.shape_cast %15 : vector<1x8xf32> to vector<1x1x8xf32>
    %17 = vector.broadcast %16 : vector<1x1x8xf32> to vector<4x8x8xf32>
    %18 = arith.addf %13, %17 : vector<4x8x8xf32>
    %cst_10 = arith.constant dense<0xFF800000> : vector<4x8xf32>
    %19 = vector.multi_reduction <maximumf>, %18, %cst_10 [2] : vector<4x8x8xf32> to vector<4x8xf32>
    %20 = vector.shape_cast %19 : vector<4x8xf32> to vector<4x8x1xf32>
    %21 = vector.broadcast %20 : vector<4x8x1xf32> to vector<4x8x8xf32>
    %22 = arith.subf %18, %21 : vector<4x8x8xf32>
    %23 = math.exp %22 : vector<4x8x8xf32>
    %cst_11 = arith.constant dense<0.000000e+00> : vector<4x8xf32>
    %24 = vector.multi_reduction <add>, %23, %cst_11 [2] : vector<4x8x8xf32> to vector<4x8xf32>
    %25 = vector.shape_cast %24 : vector<4x8xf32> to vector<4x8x1xf32>
    %26 = tpu.reciprocal %25 {approx = true} : vector<4x8x1xf32> -> vector<4x8x1xf32>
    %27 = vector.broadcast %26 : vector<4x8x1xf32> to vector<4x8x8xf32>
    %28 = arith.mulf %23, %27 : vector<4x8x8xf32>
    "tpu.trace_start"() <{level = 10 : i32, message = "hjt,hqt->hjq"}> : () -> ()
    %cst_12 = arith.constant dense<0.000000e+00> : vector<4x8x8xf32>
    %29 = tpu.matmul %12, %28, %cst_12 {dimension_numbers = #tpu.dot_dimension_numbers<[2], [2], [1], [1], [0, 0, 0, 1, 1, 1], [0], [0]>} : vector<4x8x8xf32>, vector<4x8x8xf32>, vector<4x8x8xf32> -> vector<4x8x8xf32>
    "tpu.trace_stop"() : () -> ()
    %30 = vector.shape_cast %29 : vector<4x8x8xf32> to vector<32x8xf32>
    %31 = tpu.transpose %30, [1, 0] : vector<32x8xf32> -> vector<8x32xf32>
    %c0_13 = arith.constant 0 : index
    %c0_14 = arith.constant 0 : index
    %32 = vector.load %arg5[%c0_13, %c0_14] : memref<32x32xf32, #tpu.memory_space<vmem>>, vector<32x32xf32>
    %cst_15 = arith.constant dense<0.000000e+00> : vector<8x32xf32>
    %33 = tpu.matmul %31, %32, %cst_15 {dimension_numbers = #tpu.dot_dimension_numbers<[1], [0], [0], [1], [0, 0, 1, 1], [], []>} : vector<8x32xf32>, vector<32x32xf32>, vector<8x32xf32> -> vector<8x32xf32>
    %c0_16 = arith.constant 0 : index
    %c0_17 = arith.constant 0 : index
    %34 = vector.load %arg6[%c0_16, %c0_17] : memref<1x32xf32, #tpu.memory_space<vmem>>, vector<1x32xf32>
    %35 = vector.broadcast %34 : vector<1x32xf32> to vector<8x32xf32>
    %36 = arith.addf %33, %35 : vector<8x32xf32>
    %37 = arith.addf %1, %36 : vector<8x32xf32>
    %c0_18 = arith.constant 0 : index
    %c0_19 = arith.constant 0 : index
    %38 = vector.load %arg11[%c0_18, %c0_19] : memref<1x32xf32, #tpu.memory_space<vmem>>, vector<1x32xf32>
    %c0_20 = arith.constant 0 : index
    %c0_21 = arith.constant 0 : index
    %39 = vector.load %arg12[%c0_20, %c0_21] : memref<1x32xf32, #tpu.memory_space<vmem>>, vector<1x32xf32>
    %cst_22 = arith.constant dense<0.000000e+00> : vector<8xf32>
    %40 = vector.multi_reduction <add>, %37, %cst_22 [1] : vector<8x32xf32> to vector<8xf32>
    %41 = vector.shape_cast %40 : vector<8xf32> to vector<8x1xf32>
    %cst_23 = arith.constant 3.200000e+01 : f32
    %42 = vector.broadcast %cst_23 : f32 to vector<8x1xf32>
    %43 = arith.divf %41, %42 : vector<8x1xf32>
    %44 = vector.broadcast %43 : vector<8x1xf32> to vector<8x32xf32>
    %45 = arith.subf %37, %44 : vector<8x32xf32>
    %46 = arith.mulf %45, %45 : vector<8x32xf32>
    %cst_24 = arith.constant dense<0.000000e+00> : vector<8xf32>
    %47 = vector.multi_reduction <add>, %46, %cst_24 [1] : vector<8x32xf32> to vector<8xf32>
    %48 = vector.shape_cast %47 : vector<8xf32> to vector<8x1xf32>
    %cst_25 = arith.constant 3.200000e+01 : f32
    %49 = vector.broadcast %cst_25 : f32 to vector<8x1xf32>
    %50 = arith.divf %48, %49 : vector<8x1xf32>
    %cst_26 = arith.constant 9.99999974E-6 : f32
    %51 = vector.broadcast %cst_26 : f32 to vector<8x1xf32>
    %52 = arith.addf %50, %51 : vector<8x1xf32>
    %53 = math.rsqrt %52 : vector<8x1xf32>
    %54 = vector.broadcast %53 : vector<8x1xf32> to vector<8x32xf32>
    %55 = arith.mulf %45, %54 : vector<8x32xf32>
    %56 = vector.broadcast %38 : vector<1x32xf32> to vector<8x32xf32>
    %57 = arith.mulf %55, %56 : vector<8x32xf32>
    %58 = vector.broadcast %39 : vector<1x32xf32> to vector<8x32xf32>
    %59 = arith.addf %57, %58 : vector<8x32xf32>
    %c0_27 = arith.constant 0 : index
    %c0_28 = arith.constant 0 : index
    %60 = vector.load %arg7[%c0_27, %c0_28] : memref<32x64xf32, #tpu.memory_space<vmem>>, vector<32x64xf32>
    %cst_29 = arith.constant dense<0.000000e+00> : vector<8x64xf32>
    %61 = tpu.matmul %59, %60, %cst_29 {dimension_numbers = #tpu.dot_dimension_numbers<[1], [0], [0], [1], [0, 0, 1, 1], [], []>} : vector<8x32xf32>, vector<32x64xf32>, vector<8x64xf32> -> vector<8x64xf32>
    %c0_30 = arith.constant 0 : index
    %c0_31 = arith.constant 0 : index
    %62 = vector.load %arg8[%c0_30, %c0_31] : memref<1x64xf32, #tpu.memory_space<vmem>>, vector<1x64xf32>
    %63 = vector.broadcast %62 : vector<1x64xf32> to vector<8x64xf32>
    %64 = arith.addf %61, %63 : vector<8x64xf32>
    %cst_32 = arith.constant 0.000000e+00 : f32
    %65 = vector.broadcast %cst_32 : f32 to vector<8x64xf32>
    %66 = arith.maximumf %64, %65 : vector<8x64xf32>
    %c0_33 = arith.constant 0 : index
    %c0_34 = arith.constant 0 : index
    %67 = vector.load %arg9[%c0_33, %c0_34] : memref<64x32xf32, #tpu.memory_space<vmem>>, vector<64x32xf32>
    %cst_35 = arith.constant dense<0.000000e+00> : vector<8x32xf32>
    %68 = tpu.matmul %66, %67, %cst_35 {dimension_numbers = #tpu.dot_dimension_numbers<[1], [0], [0], [1], [0, 0, 1, 1], [], []>} : vector<8x64xf32>, vector<64x32xf32>, vector<8x32xf32> -> vector<8x32xf32>
    %c0_36 = arith.constant 0 : index
    %c0_37 = arith.constant 0 : index
    %69 = vector.load %arg10[%c0_36, %c0_37] : memref<1x32xf32, #tpu.memory_space<vmem>>, vector<1x32xf32>
    %70 = vector.broadcast %69 : vector<1x32xf32> to vector<8x32xf32>
    %71 = arith.addf %68, %70 : vector<8x32xf32>
    %72 = arith.addf %59, %71 : vector<8x32xf32>
    %c0_38 = arith.constant 0 : index
    %c0_39 = arith.constant 0 : index
    %73 = vector.load %arg13[%c0_38, %c0_39] : memref<1x32xf32, #tpu.memory_space<vmem>>, vector<1x32xf32>
    %c0_40 = arith.constant 0 : index
    %c0_41 = arith.constant 0 : index
    %74 = vector.load %arg14[%c0_40, %c0_41] : memref<1x32xf32, #tpu.memory_space<vmem>>, vector<1x32xf32>
    %cst_42 = arith.constant dense<0.000000e+00> : vector<8xf32>
    %75 = vector.multi_reduction <add>, %72, %cst_42 [1] : vector<8x32xf32> to vector<8xf32>
    %76 = vector.shape_cast %75 : vector<8xf32> to vector<8x1xf32>
    %cst_43 = arith.constant 3.200000e+01 : f32
    %77 = vector.broadcast %cst_43 : f32 to vector<8x1xf32>
    %78 = arith.divf %76, %77 : vector<8x1xf32>
    %79 = vector.broadcast %78 : vector<8x1xf32> to vector<8x32xf32>
    %80 = arith.subf %72, %79 : vector<8x32xf32>
    %81 = arith.mulf %80, %80 : vector<8x32xf32>
    %cst_44 = arith.constant dense<0.000000e+00> : vector<8xf32>
    %82 = vector.multi_reduction <add>, %81, %cst_44 [1] : vector<8x32xf32> to vector<8xf32>
    %83 = vector.shape_cast %82 : vector<8xf32> to vector<8x1xf32>
    %cst_45 = arith.constant 3.200000e+01 : f32
    %84 = vector.broadcast %cst_45 : f32 to vector<8x1xf32>
    %85 = arith.divf %83, %84 : vector<8x1xf32>
    %cst_46 = arith.constant 9.99999974E-6 : f32
    %86 = vector.broadcast %cst_46 : f32 to vector<8x1xf32>
    %87 = arith.addf %85, %86 : vector<8x1xf32>
    %88 = math.rsqrt %87 : vector<8x1xf32>
    %89 = vector.broadcast %88 : vector<8x1xf32> to vector<8x32xf32>
    %90 = arith.mulf %80, %89 : vector<8x32xf32>
    %91 = vector.broadcast %73 : vector<1x32xf32> to vector<8x32xf32>
    %92 = arith.mulf %90, %91 : vector<8x32xf32>
    %93 = vector.broadcast %74 : vector<1x32xf32> to vector<8x32xf32>
    %94 = arith.addf %92, %93 : vector<8x32xf32>
    %c0_47 = arith.constant 0 : index
    %c0_48 = arith.constant 0 : index
    %c0_49 = arith.constant 0 : index
    %95 = vector.load %arg15[%c0_47, %c0_48, %c0_49] : memref<1x8x32xf32, #tpu.memory_space<vmem>>, vector<1x8x32xf32>
    %96 = vector.shape_cast %95 : vector<1x8x32xf32> to vector<8x32xf32>
    %97 = vector.shape_cast %94 : vector<8x32xf32> to vector<1x8x32xf32>
    tpu.vector_store %arg15[%c0_47, %c0_48, %c0_49], %97 {strides = array<i32>} : memref<1x8x32xf32, #tpu.memory_space<vmem>>, vector<1x8x32xf32>,
    return
  }
  func.func @transform_0(%arg0: i32) -> (i32, i32, i32) {
    %c0_i32 = arith.constant 0 : i32
    %c0_i32_0 = arith.constant 0 : i32
    %c0_i32_1 = arith.constant 0 : i32
    return %arg0, %c0_i32, %c0_i32_0 : i32, i32, i32
  }
  func.func @transform_1(%arg0: i32) -> (i32, i32, i32) {
    %c0_i32 = arith.constant 0 : i32
    %c0_i32_0 = arith.constant 0 : i32
    %c0_i32_1 = arith.constant 0 : i32
    return %arg0, %c0_i32, %c0_i32_0 : i32, i32, i32
  }
  func.func @transform_2(%arg0: i32) -> (i32, i32) {
    %c0_i32 = arith.constant 0 : i32
    %c0_i32_0 = arith.constant 0 : i32
    %c0_i32_1 = arith.constant 0 : i32
    return %c0_i32, %c0_i32_0 : i32, i32
  }
  func.func @transform_3(%arg0: i32) -> (i32, i32) {
    %c0_i32 = arith.constant 0 : i32
    %c0_i32_0 = arith.constant 0 : i32
    %c0_i32_1 = arith.constant 0 : i32
    return %c0_i32, %c0_i32_0 : i32, i32
  }
  func.func @transform_4(%arg0: i32) -> (i32, i32) {
    %c0_i32 = arith.constant 0 : i32
    %c0_i32_0 = arith.constant 0 : i32
    %c0_i32_1 = arith.constant 0 : i32
    return %c0_i32, %c0_i32_0 : i32, i32
  }
  func.func @transform_5(%arg0: i32) -> (i32, i32) {
    %c0_i32 = arith.constant 0 : i32
    %c0_i32_0 = arith.constant 0 : i32
    %c0_i32_1 = arith.constant 0 : i32
    return %c0_i32, %c0_i32_0 : i32, i32
  }
  func.func @transform_6(%arg0: i32) -> (i32, i32) {
    %c0_i32 = arith.constant 0 : i32
    %c0_i32_0 = arith.constant 0 : i32
    %c0_i32_1 = arith.constant 0 : i32
    return %c0_i32, %c0_i32_0 : i32, i32
  }
  func.func @transform_7(%arg0: i32) -> (i32, i32) {
    %c0_i32 = arith.constant 0 : i32
    %c0_i32_0 = arith.constant 0 : i32
    %c0_i32_1 = arith.constant 0 : i32
    return %c0_i32, %c0_i32_0 : i32, i32
  }
  func.func @transform_8(%arg0: i32) -> (i32, i32) {
    %c0_i32 = arith.constant 0 : i32
    %c0_i32_0 = arith.constant 0 : i32
    %c0_i32_1 = arith.constant 0 : i32
    return %c0_i32, %c0_i32_0 : i32, i32
  }
  func.func @transform_9(%arg0: i32) -> (i32, i32) {
    %c0_i32 = arith.constant 0 : i32
    %c0_i32_0 = arith.constant 0 : i32
    %c0_i32_1 = arith.constant 0 : i32
    return %c0_i32, %c0_i32_0 : i32, i32
  }
  func.func @transform_10(%arg0: i32) -> (i32, i32) {
    %c0_i32 = arith.constant 0 : i32
    %c0_i32_0 = arith.constant 0 : i32
    %c0_i32_1 = arith.constant 0 : i32
    return %c0_i32, %c0_i32_0 : i32, i32
  }
  func.func @transform_11(%arg0: i32) -> (i32, i32) {
    %c0_i32 = arith.constant 0 : i32
    %c0_i32_0 = arith.constant 0 : i32
    %c0_i32_1 = arith.constant 0 : i32
    return %c0_i32, %c0_i32_0 : i32, i32
  }
  func.func @transform_12(%arg0: i32) -> (i32, i32) {
    %c0_i32 = arith.constant 0 : i32
    %c0_i32_0 = arith.constant 0 : i32
    %c0_i32_1 = arith.constant 0 : i32
    return %c0_i32, %c0_i32_0 : i32, i32
  }
  func.func @transform_13(%arg0: i32) -> (i32, i32) {
    %c0_i32 = arith.constant 0 : i32
    %c0_i32_0 = arith.constant 0 : i32
    %c0_i32_1 = arith.constant 0 : i32
    return %c0_i32, %c0_i32_0 : i32, i32
  }
  func.func @transform_14(%arg0: i32) -> (i32, i32, i32) {
    %c0_i32 = arith.constant 0 : i32
    %c0_i32_0 = arith.constant 0 : i32
    %c0_i32_1 = arith.constant 0 : i32
    return %arg0, %c0_i32, %c0_i32_0 : i32, i32, i32
  }
}

</mosaic_0001>

<bundles_post_ra>
// kernel: tpu_custom_call.1
= control target key start
LH: loop header
LB: loop body
LE: loop exit
PB: predicated region body
PF: predicated region fallthrough
CT: control target
= control target key end

     0   :  { %19 = vsyncpa [#allocation3], 0  ;;  %s2689_s0 = inlined_call_operand.vmem [shape: f32[2,8,32], index: 0, kind: input, shape index: {}]   ;;  %s2690_s1 = inlined_call_operand.vmem [shape: f32[2,1,8], index: 1, kind: input, shape index: {}]   ;;  %s2691_s2 = inlined_call_operand.vmem [shape: f32[96,32], index: 2, kind: input, shape index: {}]   ;;  %s2692_s3 = inlined_call_operand.vmem [shape: f32[96,1], index: 3, kind: input, shape index: {}]   ;;  %s2693_s4 = inlined_call_operand.vmem [shape: f32[32,32], index: 4, kind: input, shape index: {}]   ;;  %s2694_s5 = inlined_call_operand.vmem [shape: f32[1,32], index: 5, kind: input, shape index: {}]   ;;  %s2695_s6 = inlined_call_operand.vmem [shape: f32[32,64], index: 6, kind: input, shape index: {}]   ;;  %s2696_s7 = inlined_call_operand.vmem [shape: f32[1,64], index: 7, kind: input, shape index: {}]   ;;  %s2697_s8 = inlined_call_operand.vmem [shape: f32[64,32], index: 8, kind: input, shape index: {}]   ;;  %s2698_s9 = inlined_call_operand.vmem [shape: f32[1,32], index: 9, kind: input, shape index: {}]   ;;  %s2699_s10 = inlined_call_operand.vmem [shape: f32[1,32], index: 10, kind: input, shape index: {}]   ;;  %s2700_s11 = inlined_call_operand.vmem [shape: f32[1,32], index: 11, kind: input, shape index: {}]   ;;  %s2701_s12 = inlined_call_operand.vmem [shape: f32[1,32], index: 12, kind: input, shape index: {}]   ;;  %s2702_s13 = inlined_call_operand.vmem [shape: f32[1,32], index: 13, kind: input, shape index: {}]   ;;  %s2703_s14 = inlined_call_operand.hbm [shape: f32[2,8,32], index: 14, kind: output, shape index: {}]  }
   0x1   :  { %21 = vsyncpa [#allocation3 + $0x1], 0  ;;  %s2365_s29 = smov 0   ;;  %s2367_s30 = smov 0  }
   0x2   :  { %s2369_s15 = smov 0   ;;  %s2371_s16 = smov 0  }
   0x3 LB: > { %2709 = sst [smem:[#allocation5_spill]] %s2271_s29  ;;  %s2386_s17 = sadd.s32 4294967295, %s2283_s16   ;;  %s2283_s16 = sphi %s2371_s16, %s2718_s16   ;;  %s2279_s15 = sphi %s2369_s15, %s2720_s15   ;;  %s2275_s30 = sphi %s2367_s30, %s2722_s30   ;;  %s2271_s29 = sphi %s2365_s29, %s2721_s29  }
   0x4   : > { %2710 = sst [smem:[#allocation6_spill]] %s2279_s15  ;;  %s1937_s18 = sadd.s32 4294967294, %s2283_s16  }
   0x5   : > { %s2390_s19 = sadd.s32 1, %s2283_s16   ;;  %s338_s20 = sadd.s32 1, %s2279_s15 }
   0x6   : > { %2711 = sst [smem:[#allocation7_spill]] %s2390_s19  ;;  %s335_s21 = ssub.s32 %s2283_s16, %s2390_s19 }
   0x7   : > { %p348_p0 = scmp.ne.s32.totalorder %s2279_s15, %s2275_s30  ;;  %p336_p1 = scmp.eq.s32.totalorder %s335_s21, 0 }
   0x8   : > { %p349_p2 = scmp.eq.s32.totalorder %s2386_s17, 1  ;;  %p354_p3 = scmp.ne.s32.totalorder %s2275_s30, %s2271_s29 }
   0x9   : > { %p355_p4 = scmp.eq.s32.totalorder %s1937_s18, 1  ;;  %p1940_p7 = scmp.ge.s32.totalorder %s2283_s16, 1 }
   0xa   : > { %s2401_s22 = scalar_select %p336_p1, %s2279_s15, %s338_s20  }
   0xb   : > { %p2403_p5 = por %p349_p2, %p348_p0  ;;  %p2407_p6 = por %p355_p4, %p354_p3 }
   0xc   : > { %2712 = sst [smem:[#allocation8_spill]] %s2401_s22  ;;  %p422_p8 = scmp.lt.s32.totalorder %s2283_s16, 3 }
   0xd   : > { %s2714_s24 = scalar_select %p2407_p6, 1, 0 }
   0xe   : > { %p423_p9 = pnand %p1940_p7, %p422_p8 }
   0xf   : > { %2715 = sst [smem:[#allocation9_spill]] %s2714_s24  ;;  %p470_p10 = scmp.lt.s32.totalorder (!%p423_p9), %s2386_s17, 1  ;;  %vm562_vm0 = vcmask (!%p423_p9), 261120   ;;  %v478_v0 = vld [vmem:[%s2691_s2] sm:$0xff] (!%p423_p9)  ;;  %v2285_v1 = vmov (!%p423_p9), 0   ;;  %v492_v3 = vld [vmem:[%s2692_s3 + $0x10] sm:$0xff] (!%p423_p9) }
  0x10   : > { %426 = sbr.rel (%p423_p9) target bundleno = 2538 (0x9ea), region = 76  ;;  %2033 = vmatprep.mubr.msk.f32.mxu0 (!%p423_p9), %vm562_vm0, %v478_v0  ;;  %2199 = vset.pattern.permute.xlu0 (!%p423_p9), %v2285_v1  ;;  %v490_v2 = vld [vmem:[%s2692_s3] sm:$0xff] (!%p423_p9)  ;;  %v491_v4 = vld [vmem:[%s2692_s3 + $0x8] sm:$0xff] (!%p423_p9)  ;;  %v493_v5 = vld [vmem:[%s2692_s3 + $0x18] sm:$0xff] (!%p423_p9)  ;;  %v2286_v18 = vmov (!%p423_p9), 0.0   ;;  %vm2287_vm1 = vmmov (!%p423_p9), 0  }
  0x11   : > { %2200 = vset.pattern.permute.xlu1 (!%p423_p9), %v2285_v1  ;;  %504 = vperm.xlu0 (!%p423_p9), %2199, %v490_v2   ;;  %v479_v7 = vld [vmem:[%s2691_s2 + $0x8] sm:$0xff] (!%p423_p9)  ;;  %v494_v8 = vld [vmem:[%s2692_s3 + $0x20] sm:$0xff] (!%p423_p9)  ;;  %v480_v9 = vld [vmem:[%s2691_s2 + $0x10] sm:$0xff] (!%p423_p9)  ;;  %vm862_vm2 = vcmask (!%p423_p9), 64512   ;;  %vm1750_vm3 = vcmask (!%p423_p9), 523264   ;;  %s467_s20 = sand.u32 (!%p423_p9), 1, %s2275_s30  }
  0x12   : > { %514 = vperm.xlu1 (!%p423_p9), %2200, %v492_v3   ;;  %v495_v10 = vld [vmem:[%s2692_s3 + $0x28] sm:$0xff] (!%p423_p9)  ;;  %v481_v11 = vld [vmem:[%s2691_s2 + $0x18] sm:$0xff] (!%p423_p9)  ;;  %v496_v12 = vld [vmem:[%s2692_s3 + $0x30] sm:$0xff] (!%p423_p9)  ;;  %2051 = vmatprep.subr.mxu1 (!%p423_p9), %v2286_v18  ;;  %s1941_s21 = sshll.u32 (!%p423_p9), %s467_s20, 3  ;;  %s1856_s15 = scalar_lea.sflag (!%p423_p9), [#allocation3], %s467_s20 }
  0x13   : > { %v482_v13 = vld [vmem:[%s2691_s2 + $0x20] sm:$0xff] (!%p423_p9)  ;;  %v497_v14 = vld [vmem:[%s2692_s3 + $0x38] sm:$0xff] (!%p423_p9)  ;;  %v483_v15 = vld [vmem:[%s2691_s2 + $0x28] sm:$0xff] (!%p423_p9)  ;;  %2053 = vmatprep.mubr.msk.f32.mxu1 (!%p423_p9), %vm2287_vm1, %v2286_v18  ;;  %s469_s25 = scalar_lea.vmem (!%p423_p9), [#allocation2], %s1941_s21 }
  0x14   : > { %v484_v16 = vld [vmem:[%s2691_s2 + $0x30] sm:$0xff] (!%p423_p9)  ;;  %v485_v17 = vld [vmem:[%s2691_s2 + $0x38] sm:$0xff] (!%p423_p9)  ;;  %v486_v37 = vld [vmem:[%s2691_s2 + $0x40] sm:$0xff] (!%p423_p9)  ;;  %s1869_s26 = sshll.u32 (!%p423_p9), %s469_s25, 4  ;;  %s2648_s26 = int_to_ptr.vmem [resolvable:$true] %s1869_s26 }
  0x15   : > { %509 = vperm.xlu0 (!%p423_p9), %2199, %v491_v4   ;;  %v487_v38 = vld [vmem:[%s2691_s2 + $0x48] sm:$0xff] (!%p423_p9)  ;;  %v488_v49 = vld [vmem:[%s2691_s2 + $0x50] sm:$0xff] (!%p423_p9)  ;;  %v489_v50 = vld [vmem:[%s2691_s2 + $0x58] sm:$0xff] (!%p423_p9)  ;;  %s2221_s29 = scalar_lea.vmem (!%p423_p9), %s2648_s26, 128 }
  0x16   : > { %519 = vperm.xlu1 (!%p423_p9), %2200, %v493_v5   ;;  %v498_v4 = vld [vmem:[%s2692_s3 + $0x40] sm:$0xff] (!%p423_p9)  ;;  %p2222_p11 = scmp.ne.s32.totalorder (!%p423_p9), %s2648_s26, %s2221_s29 }
  0x17   : > { %s2419_s27 = scalar_select %p470_p10, %s2386_s17, 1 }
  0x18   : > { %p2223_p12 = pnand %p2222_p11, %p2403_p5 }
  0x19   : > { %s1942_s22 = sshll.u32 %s2419_s27, 3  ;;  %524 = vperm.xlu0 %2199, %v494_v8   ;;  %s476_s28 = scalar_lea.vmem %s2690_s1, %s2419_s27 }
  0x1a   : > { %s473_s24 = scalar_lea.vmem %s2689_s0, %s1942_s22  ;;  %529 = vperm.xlu1 %2200, %v495_v10   ;;  %v1956_v51 = vld [vmem:[%s476_s28] ss:$0 sm:$0xff]  ;;  %p2224_p13 = pneg %p2223_p12 }
  0x1b   : > { %v2437_v6 = vld [vmem:[%s473_s24] sm:$0xff]  ;;  %s1980_s24 = sshll.u32 %s2386_s17, 7  ;;  %s2289_s17 = smov [#allocation2]  }
  0x1c   : > { %2031 = vmatprep.subr.msk.mxu0 %vm562_vm0, %v2437_v6  ;;  %s2646_s18 = scalar_lea.hbm %s2703_s14, %s1980_s24  ;;  %s2225_s21 = sshll.u32 %s2289_s17, 4  ;;  %s2226_s21 = int_to_ptr.vmem [resolvable:$false] %s2225_s21 }
  0x1d   : > { %2032 = vmatpush3.xpose.msk.msra.mxu0 %vm562_vm0, %v2437_v6  ;;  %534 = vperm.xlu0 %2199, %v496_v12   ;;  %s2227_s19 = scalar_lea.vmem %s2226_s21, 256  ;;  %p2228_p0 = scmp.lt.s32.totalorder %s2648_s26, %s2226_s21 }
  0x1e   : > { %539 = vperm.xlu1 %2200, %v497_v14   ;;  %2086 = vmatprep.subr.mxu0 %v2286_v18  ;;  %p2229_p1 = scmp.lt.s32.totalorder %s2227_s19, %s2221_s29 }
  0x20   : > { %2034 = vmatmul.mubr.msk.f32.vlgmr.msra.gmra.mrb[0].mxu0 %vm562_vm0, %v479_v7  ;;  %p2230_p2 = por %p2229_p1, %p2228_p0 }
  0x21   : > { %2036 = vmatprep.mubr.msk.f32.mxu0 %vm562_vm0, %v480_v9 }
  0x22   : > { %p2231_p3 = pnand %p2230_p2, %p2224_p13 }
  0x24   : > { %2037 = vmatmul.mubr.msk.f32.gmra.mrb[2].mxu0 %vm562_vm0, %v481_v11 }
  0x25   : > { %2039 = vmatprep.mubr.msk.f32.mxu0 %vm562_vm0, %v482_v13 }
  0x28   : > { %2040 = vmatmul.mubr.msk.f32.gmra.mrb[4].mxu0 %vm562_vm0, %v483_v15 }
  0x29   : > { %2042 = vmatprep.mubr.msk.f32.mxu0 %vm562_vm0, %v484_v16 }
  0x2c   : > { %2043 = vmatmul.mubr.msk.f32.gmra.mrb[6].mxu0 %vm562_vm0, %v485_v17 }
  0x2d   : > { %2045 = vmatprep.mubr.msk.f32.mxu0 %vm562_vm0, %v486_v37 }
  0x30   : > { %2046 = vmatmul.mubr.msk.f32.gmra.mrb[8].mxu0 %vm562_vm0, %v487_v38 }
  0x31   : > { %2048 = vmatprep.mubr.msk.f32.mxu0 %vm562_vm0, %v488_v49 }
  0x34   : > { %2049 = vmatmul.mubr.msk.f32.gmra.mrb[10].mxu0 %vm562_vm0, %v489_v50 }
  0x35   : > { %2088 = vmatprep.mubr.msk.f32.mxu0 %vm2287_vm1, %v2286_v18 }
  0x90   : > { %v505_v19 = vpop.permute.xlu0 %504 }
  0x91   : > { %v515_v22 = vpop.permute.xlu1 %514 }
  0x94   : > { %v510_v20 = vpop.permute.xlu0 %509 }
  0x95   : > { %v520_v29 = vpop.permute.xlu1 %519 }
  0x98   : > { %v525_v32 = vpop.permute.xlu0 %524 }
  0x99   : > { %v530_v39 = vpop.permute.xlu1 %529 }
  0x9c   : > { %v535_v40 = vpop.permute.xlu0 %534 }
  0x9d   : > { %v540_v41 = vpop.permute.xlu1 %539 }
  0xf3   : > { %v2035_v21 = vpop.f32.mrb[0].mxu0 }
  0xf4   : > { %v674_v23 = vadd.f32 %v2035_v21, %v510_v20  ;;  %v668_v24 = vpop.f32.mrb[1].mxu0 }
  0xf5   : > { %v669_v25 = vadd.f32 %v668_v24, %v505_v19 }
  0xf6   : > { %759 = vxpose.xlu1.b32.start.end [1/1] (short) (narrow) %v674_v23, 8 }
  0xf7   : > { %v2038_v26 = vpop.f32.mrb[2].mxu0  ;;  %727 = vxpose.xlu0.b32.start.end [1/1] (short) (narrow) %v669_v25, 8 }
  0xf8   : > { %v678_v27 = vpop.f32.mrb[3].mxu0  ;;  %v684_v30 = vadd.f32 %v2038_v26, %v520_v29  ;;  %v500_v29 = vld [vmem:[%s2692_s3 + $0x50] sm:$0xff] }
  0xf9   : > { %v679_v28 = vadd.f32 %v678_v27, %v515_v22 }
  0xfb   : > { %v2041_v31 = vpop.f32.mrb[4].mxu0  ;;  %791 = vxpose.xlu0.b32.start.end [1/1] (short) (narrow) %v679_v28, 8 }
  0xfc   : > { %v688_v33 = vpop.f32.mrb[5].mxu0  ;;  %v694_v42 = vadd.f32 %v2041_v31, %v530_v39  ;;  %v501_v31 = vld [vmem:[%s2692_s3 + $0x58] sm:$0xff] }
  0xfd   : > { %v689_v34 = vadd.f32 %v688_v33, %v525_v32  ;;  %v499_v33 = vld [vmem:[%s2692_s3 + $0x48] sm:$0xff] }
  0xff   : > { %v2044_v35 = vpop.f32.mrb[6].mxu0  ;;  %2052 = vmatpush3.msra.mxu1 %v689_v34  ;;  %823 = vxpose.xlu0.b32.start.end [1/1] (short) (narrow) %v684_v30, 8 }
 0x100   : > { %v698_v36 = vpop.f32.mrb[7].mxu0  ;;  %2056 = vmatprep.subr.mxu1 %v2286_v18  ;;  %v704_v47 = vadd.f32 %v2044_v35, %v540_v41 }
 0x101   : > { %v699_v45 = vadd.f32 %v698_v36, %v535_v40 }
 0x103   : > { %v2047_v5 = vpop.f32.mrb[8].mxu0 }
 0x104   : > { %v708_v7 = vpop.f32.mrb[9].mxu0 }
 0x107   : > { %v2050_v30 = vpop.f32.mrb[10].mxu0 }
 0x108   : > { %v718_v32 = vpop.f32.mrb[11].mxu0 }
 0x176   : > { %v775_v44 = vpop.trf.xlu1 }
 0x177   : > { %v743_v43 = vpop.trf.xlu0 }
 0x178   : > { %2054 = vmatmul.mubr.msk.f32.vlgmr.msra.gmra.mrb[0].mxu1 %vm862_vm2, %v743_v43 }
 0x179   : > { %2057 = vmatpush3.msra.mxu1 %v694_v42  ;;  %2058 = vmatprep.mubr.msk.f32.mxu1 %vm2287_vm1, %v2286_v18 }
 0x17a   : > { %2061 = vmatprep.subr.mxu1 %v2286_v18 }
 0x17b   : > { %v807_v46 = vpop.trf.xlu0 }
 0x17c   : > { %2059 = vmatmul.mubr.msk.f32.vlgmr.msra.gmra.mrb[2].mxu1 %vm862_vm2, %v775_v44 }
 0x17d   : > { %2062 = vmatpush3.msra.mxu1 %v699_v45  ;;  %2063 = vmatprep.mubr.msk.f32.mxu1 %vm2287_vm1, %v2286_v18 }
 0x17e   : > { %2066 = vmatprep.subr.mxu1 %v2286_v18 }
 0x17f   : > { %v839_v48 = vpop.trf.xlu0 }
 0x180   : > { %2064 = vmatmul.mubr.msk.f32.vlgmr.msra.gmra.mrb[4].mxu1 %vm862_vm2, %v807_v46 }
 0x181   : > { %2067 = vmatpush3.msra.mxu1 %v704_v47  ;;  %2068 = vmatprep.mubr.msk.f32.mxu1 %vm2287_vm1, %v2286_v18 }
 0x182   : > { %2071 = vmatprep.subr.mxu1 %v2286_v18 }
 0x184   : > { %2069 = vmatmul.mubr.msk.f32.vlgmr.msra.gmra.mrb[6].mxu1 %vm862_vm2, %v839_v48 }
 0x185   : > { %2073 = vmatprep.mubr.msk.f32.mxu1 %vm2287_vm1, %v2286_v18 }
 0x24b   : > { %v932_v52 = vpop.f32.mrb[0].mxu1 }
 0x24c   : > { %v933_v53 = vadd.f32 %v1956_v51, %v932_v52  ;;  %v2055_v54 = vpop.f32.mrb[1].mxu1 }
 0x24d   : > { %v1535_v54 = vld [vmem:[%s2693_s4] sm:$0xff] }
 0x24e   : > { %v1155_v55 = vsel %vm862_vm2, %v933_v53, -inf }
 0x24f   : > { %1156 = vmax.xlane.f32.xlu0 %v1155_v55  ;;  %v1005_v56 = vpop.f32.mrb[2].mxu1  ;;  %v1536_v55 = vld [vmem:[%s2693_s4 + $0x8] sm:$0xff] }
 0x250   : > { %v1006_v57 = vadd.f32 %v1956_v51, %v1005_v56  ;;  %v2060_v58 = vpop.f32.mrb[3].mxu1  ;;  %v1537_v56 = vld [vmem:[%s2693_s4 + $0x10] sm:$0xff] }
 0x251   : > { %v2133_v58 = vpack.c.bf16 %v1536_v55, %v1535_v54 }
 0x252   : > { %v1158_v59 = vsel %vm862_vm2, %v1006_v57, -inf }
 0x253   : > { %1159 = vmax.xlane.f32.xlu1 %v1158_v59  ;;  %v1078_v60 = vpop.f32.mrb[4].mxu1  ;;  %v1538_v59 = vld [vmem:[%s2693_s4 + $0x18] sm:$0xff] }
 0x254   : > { %v1079_v61 = vadd.f32 %v1956_v51, %v1078_v60  ;;  %v2065_v62 = vpop.f32.mrb[5].mxu1  ;;  %v2136_v60 = vpack.c.bf16 %v1538_v59, %v1537_v56 }
 0x256   : > { %v1161_v63 = vsel %vm862_vm2, %v1079_v61, -inf }
 0x257   : > { %1162 = vmax.xlane.f32.xlu1 %v1161_v63  ;;  %v1151_v0 = vpop.f32.mrb[6].mxu1 }
 0x258   : > { %v1152_v1 = vadd.f32 %v1956_v51, %v1151_v0  ;;  %v2070_v2 = vpop.f32.mrb[7].mxu1 }
 0x25a   : > { %v1164_v3 = vsel %vm862_vm2, %v1152_v1, -inf }
 0x25b   : > { %1165 = vmax.xlane.f32.xlu0 %v1164_v3 }
 0x268   : > { %544 = vperm.xlu1 %2200, %v498_v4  }
 0x2dc   : > { %v1157_v8 = vpop.xlane.xlu0 %1156 }
 0x2dd   : > { %v1167_v9 = vsub.f32 %v933_v53, %v1157_v8 }
 0x2df   : > { %v1171_v10 = vmul.f32 1.442695, %v1167_v9 }
 0x2e0   : > { %v1160_v11 = vpop.xlane.xlu1 %1159 }
 0x2e1   : > { %2201 = vpow2.f32 %v1171_v10  ;;  %v1168_v12 = vsub.f32 %v1006_v57, %v1160_v11  ;;  %v2288_v57 = vmov 0.0|0.0  }
 0x2e3   : > { %v1173_v13 = vmul.f32 1.442695, %v1168_v12 }
 0x2e4   : > { %v1163_v14 = vpop.xlane.xlu1 %1162 }
 0x2e5   : > { %2203 = vpow2.f32 %v1173_v13  ;;  %v1169_v15 = vsub.f32 %v1079_v61, %v1163_v14 }
 0x2e7   : > { %v1175_v16 = vmul.f32 1.442695, %v1169_v15 }
 0x2e8   : > { %v1166_v17 = vpop.xlane.xlu0 %1165  ;;  %v545_v34 = vpop.permute.xlu1 %544 }
 0x2e9   : > { %2205 = vpow2.f32 %v1175_v16  ;;  %v1170_v19 = vsub.f32 %v1152_v1, %v1166_v17  ;;  %v709_v42 = vadd.f32 %v708_v7, %v545_v34  ;;  %v1969_v7 = vld [vmem:[%s2694_s5] ss:$0 sm:$0xff] }
 0x2eb   : > { %v2202_v20 = vpop.eup %2201  ;;  %v1177_v21 = vmul.f32 1.442695, %v1170_v19  ;;  %v1651_v19 = vld [vmem:[%s2695_s6 + $0x8] sm:$0xff] }
 0x2ec   : > { %v1179_v22 = vsel %vm862_vm2, %v2202_v20, 0.0 }
 0x2ed   : > { %2207 = vpow2.f32 %v1177_v21  ;;  %1180 = vadd.xlane.f32.xlu1 %v1179_v22  ;;  %v1653_v21 = vld [vmem:[%s2695_s6 + $0x18] sm:$0xff] }
 0x2ef   : > { %v2204_v23 = vpop.eup %2203 }
 0x2f0   : > { %v1182_v24 = vsel %vm862_vm2, %v2204_v23, 0.0 }
 0x2f1   : > { %1183 = vadd.xlane.f32.xlu0 %v1182_v24  ;;  %v1736_v24 = vld [vmem:[%s2697_s8 + $0x8] sm:$0xff] }
 0x2f3   : > { %v2206_v25 = vpop.eup %2205 }
 0x2f4   : > { %v1185_v26 = vsel %vm862_vm2, %v2206_v25, 0.0 }
 0x2f5   : > { %1186 = vadd.xlane.f32.xlu1 %v1185_v26 }
 0x2f7   : > { %v2208_v27 = vpop.eup %2207 }
 0x2f8   : > { %v1188_v28 = vsel %vm862_vm2, %v2208_v27, 0.0 }
 0x2f9   : > { %1189 = vadd.xlane.f32.xlu0 %v1188_v28 }
 0x306   : > { %554 = vperm.xlu1 %2200, %v500_v29   ;;  %v1739_v29 = vld [vmem:[%s2697_s8 + $0x20] sm:$0xff] }
 0x30a   : > { %559 = vperm.xlu1 %2200, %v501_v31  }
 0x30f   : > { %549 = vperm.xlu0 %2199, %v499_v33  }
 0x37a   : > { %v1181_v35 = vpop.xlane.xlu1 %1180 }
 0x37b   : > { %2209 = vrcp.f32 %v1181_v35 }
 0x37e   : > { %v1184_v36 = vpop.xlane.xlu0 %1183 }
 0x37f   : > { %2211 = vrcp.f32 %v1184_v36  ;;  %v1971_v36 = vld [vmem:[%s2699_s10] ss:$0 sm:$0xff] }
 0x382   : > { %v1187_v37 = vpop.xlane.xlu1 %1186 }
 0x383   : > { %2213 = vrcp.f32 %v1187_v37 }
 0x385   : > { %v2210_v38 = vpop.eup %2209 }
 0x386   : > { %v1195_v39 = vmul.f32 %v2210_v38, %v2202_v20  ;;  %v1190_v40 = vpop.xlane.xlu0 %1189  ;;  %v555_v44 = vpop.permute.xlu1 %554  ;;  %v1972_v38 = vld [vmem:[%s2700_s11] ss:$0 sm:$0xff] }
 0x387   : > { %2215 = vrcp.f32 %v1190_v40  ;;  %v719_v52 = vadd.f32 %v718_v32, %v555_v44  ;;  %v1973_v44 = vld [vmem:[%s2696_s7] ss:$0 sm:$0xff] }
 0x388   : > { %2072 = vmatpush3.xpose.msk.msra.mxu1 %vm862_vm2, %v1195_v39 }
 0x389   : > { %v2212_v41 = vpop.eup %2211  ;;  %2076 = vmatprep.subr.mxu1 %v2286_v18 }
 0x38a   : > { %v1196_v43 = vmul.f32 %v2212_v41, %v2204_v23  ;;  %v560_v51 = vpop.permute.xlu1 %559  ;;  %v1735_v23 = vld [vmem:[%s2697_s8] sm:$0xff]  ;;  %v1741_v41 = vld [vmem:[%s2697_s8 + $0x30] sm:$0xff] }
 0x38b   : > { %2074 = vmatmul.mubr.msk.f32.vlgmr.msra.gmra.mrb[8].mxu1 %vm862_vm2, %v709_v42  ;;  %v724_v53 = vadd.f32 %v2050_v30, %v560_v51  ;;  %v2145_v26 = vpack.c.bf16 %v1736_v24, %v1735_v23  ;;  %v1740_v30 = vld [vmem:[%s2697_s8 + $0x28] sm:$0xff]  ;;  %v1742_v42 = vld [vmem:[%s2697_s8 + $0x38] sm:$0xff] }
 0x38c   : > { %2077 = vmatpush3.xpose.msk.msra.mxu1 %vm862_vm2, %v1196_v43  ;;  %2078 = vmatprep.mubr.msk.f32.mxu1 %vm2287_vm1, %v2286_v18  ;;  %v2151_v31 = vpack.c.bf16 %v1740_v30, %v1739_v29  ;;  %v2154_v43 = vpack.c.bf16 %v1742_v42, %v1741_v41 }
 0x38d   : > { %v2214_v45 = vpop.eup %2213  ;;  %2081 = vmatprep.subr.mxu1 %v2286_v18 }
 0x38e   : > { %v1197_v46 = vmul.f32 %v2214_v45, %v2206_v25  ;;  %v550_v47 = vpop.permute.xlu0 %549  ;;  %v1737_v25 = vld [vmem:[%s2697_s8 + $0x10] sm:$0xff] }
 0x38f   : > { %v714_v48 = vadd.f32 %v2047_v5, %v550_v47 }
 0x391   : > { %v2216_v49 = vpop.eup %2215  ;;  %2079 = vmatmul.mubr.msk.f32.vlgmr.msra.gmra.mrb[10].mxu1 %vm862_vm2, %v714_v48 }
 0x392   : > { %v1198_v50 = vmul.f32 %v2216_v49, %v2208_v27  ;;  %2082 = vmatpush3.xpose.msk.msra.mxu1 %vm862_vm2, %v1197_v46  ;;  %2083 = vmatprep.mubr.msk.f32.mxu1 %vm2287_vm1, %v2286_v18  ;;  %v1738_v27 = vld [vmem:[%s2697_s8 + $0x18] sm:$0xff]  ;;  %v1975_v49 = vld [vmem:[%s2698_s9] ss:$0 sm:$0xff] }
 0x393   : > { %2144 = vmatprep.subr.bf16.mxu1 %v2288_v57  ;;  %v2148_v28 = vpack.c.bf16 %v1738_v27, %v1737_v25 }
 0x394   : > { %2087 = vmatpush3.xpose.msk.msra.mxu0 %vm862_vm2, %v1198_v50 }
 0x395   : > { %2084 = vmatmul.mubr.msk.f32.vlgmr.msra.gmra.mrb[12].mxu1 %vm862_vm2, %v719_v52  ;;  %2132 = vmatprep.subr.bf16.mxu0 %v2288_v57 }
 0x396   : > { %2129 = vmatprep.mubr.msk.f32.mxu1 %vm2287_vm1, %v2286_v18  ;;  %2146 = vmatpush3.bf16.msra.mxu1 %v2145_v26 }
 0x397   : > { %2089 = vmatmul.mubr.msk.f32.vlgmr.msra.gmra.mrb[12].mxu0 %vm862_vm2, %v724_v53  ;;  %2147 = vmatprep.subr.bf16.mxu1 %v2288_v57 }
 0x398   : > { %2099 = vmatprep.mubr.msk.f32.mxu0 %vm2287_vm1, %v2286_v18  ;;  %2134 = vmatpush3.bf16.msra.mxu0 %v2133_v58 }
 0x399   : > { %2135 = vmatprep.subr.bf16.mxu0 %v2288_v57 }
 0x39a   : > { %2149 = vmatpush3.bf16.msra.mxu1 %v2148_v28 }
 0x39b   : > { %2150 = vmatprep.subr.bf16.mxu1 %v2288_v57 }
 0x39c   : > { %2137 = vmatpush3.bf16.msra.mxu0 %v2136_v60 }
 0x39d   : > { %2138 = vmatprep.subr.bf16.mxu0 %v2288_v57 }
 0x39e   : > { %2152 = vmatpush3.bf16.msra.mxu1 %v2151_v31 }
 0x39f   : > { %2153 = vmatprep.subr.bf16.mxu1 %v2288_v57 }
 0x3a2   : > { %2155 = vmatpush3.bf16.msra.mxu1 %v2154_v43 }
 0x45e   : > { %v1271_v61 = vpop.f32.mrb[8].mxu1 }
 0x45f   : > { %v2075_v62 = vpop.f32.mrb[9].mxu1  ;;  %1503 = vxpose.xlu0.b32.start [1/4] (short) (narrow) %v1271_v61, 8 }
 0x464   : > { %v1347_v63 = vpop.f32.mrb[10].mxu1 }
 0x465   : > { %1504 = vxpose.xlu0.b32.cont [2/4] (short) (narrow) %v1347_v63, 8  ;;  %v2080_v0 = vpop.f32.mrb[11].mxu1 }
 0x466   : > { %v1977_v0 = vld [vmem:[%s2701_s12] ss:$0 sm:$0xff] }
 0x468   : > { %v1423_v1 = vpop.f32.mrb[12].mxu1 }
 0x469   : > { %1505 = vxpose.xlu0.b32.cont [3/4] (short) (narrow) %v1423_v1, 8  ;;  %v2085_v2 = vpop.f32.mrb[13].mxu1 }
 0x46a   : > { %v1499_v3 = vpop.f32.mrb[12].mxu0  ;;  %v1978_v2 = vld [vmem:[%s2702_s13] ss:$0 sm:$0xff] }
 0x46b   : > { %v2090_v4 = vpop.f32.mrb[13].mxu0 }
 0x46d   : > { %1506 = vxpose.xlu0.b32.end [4/4] (short) (narrow) %v1499_v3, 8 }
 0x4e1   : > { %v1519_v5 = vpop.trf.xlu0 }
 0x4e2   : > { %2100 = vmatmul.mubr.msk.f32.vlgmr.msra.gmra.mrb[14].mxu0 %vm562_vm0, %v1519_v5 }
 0x4e3   : > { %2110 = vmatprep.mubr.msk.f32.mxu0 %vm2287_vm1, %v2286_v18  ;;  %v1650_v18 = vld [vmem:[%s2695_s6] sm:$0xff] }
 0x4e4   : > { %v2139_v20 = vpack.c.bf16 %v1651_v19, %v1650_v18 }
 0x4e6   : > { %2140 = vmatpush3.bf16.msra.mxu0 %v2139_v20 }
 0x4e7   : > { %2141 = vmatprep.subr.bf16.mxu0 %v2288_v57 }
 0x5b5   : > { %v1615_v8 = vpop.f32.mrb[14].mxu0 }
 0x5b6   : > { %v1616_v9 = vadd.f32 %v1969_v7, %v1615_v8  ;;  %v2101_v10 = vpop.f32.mrb[15].mxu0 }
 0x5b8   : > { %v1619_v11 = vadd.f32 %v1616_v9, %v2437_v6  ;;  %v1652_v6 = vld [vmem:[%s2695_s6 + $0x10] sm:$0xff] }
 0x5b9   : > { %v2142_v22 = vpack.c.bf16 %v1653_v21, %v1652_v6 }
 0x5ba   : > { %v1622_v12 = vsel %vm562_vm0, %v1619_v11, 0.0 }
 0x5bb   : > { %1623 = vadd.xlane.f32.xlu1 %v1622_v12  ;;  %2143 = vmatpush3.bf16.msra.mxu0 %v2142_v22 }
 0x648   : > { %v1624_v13 = vpop.xlane.xlu1 %1623 }
 0x649   : > { %v1626_v14 = vmul.f32 0.03125, %v1624_v13 }
 0x64b   : > { %v1627_v15 = vsub.f32 %v1619_v11, %v1626_v14 }
 0x64d   : > { %v1628_v16 = vmul.f32 %v1627_v15, %v1627_v15 }
 0x64f   : > { %v1629_v17 = vsel %vm562_vm0, %v1628_v16, 0.0 }
 0x650   : > { %1630 = vadd.xlane.f32.xlu1 %v1629_v17 }
 0x6dd   : > { %v1631_v32 = vpop.xlane.xlu1 %1630 }
 0x6de   : > { %v1632_v33 = vmul.f32 0.03125, %v1631_v32 }
 0x6e0   : > { %v1633_v34 = vadd.f32 1e-05, %v1632_v33 }
 0x6e2   : > { %2217 = vrsqrt.f32 %v1633_v34 }
 0x6ec   : > { %v2218_v35 = vpop.eup %2217 }
 0x6ed   : > { %v1635_v37 = vmul.f32 %v2218_v35, %v1627_v15 }
 0x6ef   : > { %v1642_v39 = vmul.f32 %v1971_v36, %v1635_v37 }
 0x6f1   : > { %v1649_v40 = vadd.f32 %v1972_v38, %v1642_v39 }
 0x6f3   : > { %2111 = vmatmul.mubr.msk.f32.vlgmr.msra.gmra.mrb[16].mxu0 %vm562_vm0, %v1649_v40 }
 0x7c6   : > { %v1730_v45 = vpop.f32.mrb[16].mxu0 }
 0x7c7   : > { %v1731_v46 = vadd.f32 %v1973_v44, %v1730_v45  ;;  %v2112_v47 = vpop.f32.mrb[17].mxu0 }
 0x7c9   : > { %v1734_v48 = vmax.f32 %v1731_v46, 0.0 }
 0x7cb   : > { %2130 = vmatmul.mubr.msk.f32.vlgmr.msra.gmra.mrb[14].mxu1 %vm1750_vm3, %v1734_v48 }
 0x89e   : > { %v1820_v50 = vpop.f32.mrb[14].mxu1 }
 0x89f   : > { %v1821_v51 = vadd.f32 %v1975_v49, %v1820_v50  ;;  %v2131_v52 = vpop.f32.mrb[15].mxu1 }
 0x8a1   : > { %v1824_v53 = vadd.f32 %v1821_v51, %v1649_v40 }
 0x8a3   : > { %v1827_v54 = vsel %vm562_vm0, %v1824_v53, 0.0 }
 0x8a4   : > { %1828 = vadd.xlane.f32.xlu1 %v1827_v54 }
 0x931   : > { %v1829_v55 = vpop.xlane.xlu1 %1828 }
 0x932   : > { %v1830_v56 = vmul.f32 0.03125, %v1829_v55 }
 0x934   : > { %v1831_v57 = vsub.f32 %v1824_v53, %v1830_v56 }
 0x936   : > { %v1832_v58 = vmul.f32 %v1831_v57, %v1831_v57 }
 0x938   : > { %v1833_v59 = vsel %vm562_vm0, %v1832_v58, 0.0 }
 0x939   : > { %1834 = vadd.xlane.f32.xlu0 %v1833_v59 }
 0x9c6   : > { %v1835_v60 = vpop.xlane.xlu0 %1834 }
 0x9c7   : > { %v1836_v61 = vmul.f32 0.03125, %v1835_v60 }
 0x9c9   : > { %v1837_v62 = vadd.f32 1e-05, %v1836_v61 }
 0x9cb   : > { %2219 = vrsqrt.f32 %v1837_v62 }
 0x9d5   : > { %v2220_v63 = vpop.eup %2219 }
 0x9d6   : > { %v1839_v1 = vmul.f32 %v2220_v63, %v1831_v57 }
 0x9d8   : > { %v1846_v3 = vmul.f32 %v1977_v0, %v1839_v1 }
 0x9da   : > { %v1853_v4 = vadd.f32 %v1978_v2, %v1846_v3 }
 0x9dc   : > { %1854 = vst.msk [vmem:[%s469_s25] sm:$0xff] %vm562_vm0, %v1853_v4 }
 0x9dd   : > { %2234 = shalt.err (!%p2231_p3)
}
 0x9de   : > { %s2235_s20 = scalar_lea.hbm %s2646_s18, 128  ;;  %s2239_s25 = scalar_lea.hbm %s2703_s14, 256 }
 0x9df   : > { %p2236_p4 = scmp.ne.s32.totalorder %s2646_s18, %s2235_s20  ;;  %p2240_p9 = scmp.lt.u32.totalorder %s2646_s18, %s2703_s14 }
 0x9e0   : > { %p2241_p10 = scmp.lt.u32.totalorder %s2239_s25, %s2235_s20  ;;  %p2243_p12 = scmp.lt.u32.totalorder %s2235_s20, %s2646_s18 }
 0x9e1   : > { %p2237_p7 = pnand %p2236_p4, %p2403_p5 }
 0x9e2   : > { %p2242_p11 = por %p2241_p10, %p2240_p9 }
 0x9e3   : > { %p2238_p8 = pneg %p2237_p7 }
 0x9e4   : > { %p2244_p13 = por %p2243_p12, %p2242_p11 }
 0x9e6   : > { %p2245_p0 = pnand %p2244_p13, %p2238_p8 }
 0x9e8   : > { %2248 = shalt.err (!%p2245_p0)
}
 0x9e9   : > { %2156 = dma.vmem_to_hbm [thread:$0]  (%p2403_p5), %s2648_s26, 128, %s2646_s18, %s1856_s15  }
 0x9ea PF: > { %s2716_s29 = sld [smem:[#allocation5_spill]]  ;;  %p2162_p1 = scmp.ge.s32.totalorder %s2283_s16, 2 }
 0x9ec   : > { %p2159_p2 = pnand %p2162_p1, %p2407_p6 }
 0x9f0   : > { %s1881_s21 = sand.u32 1, %s2716_s29  }
 0x9f1   : > { %s1882_s19 = scalar_lea.sflag [#allocation3], %s1881_s21 }
 0x9f2   : > { %2266 = dma.done.wait (!%p2159_p2), %s1882_s19, 128  }
 0x9f3   : > { %2268 = vsyncadd (!%p2159_p2), %s1882_s19, 4294967168  ;;  %s2718_s16 = sld [smem:[#allocation7_spill]]  ;;  %s2719_s20 = sld [smem:[#allocation6_spill]] }
 0x9f4   : > { %s2720_s15 = sld [smem:[#allocation8_spill]]  ;;  %s2721_s29 = smov %s2275_s30 }
 0x9f9   : > { %p24_p3 = scmp.ge.s32.totalorder %s2718_s16, 4   ;;  %s2722_s30 = smov %s2719_s20 }
 0x9fb   :  { %26 = sbr.rel (!%p24_p3) target bundleno = 3 (0x3), region = 114 }
 0xa02   :  { %1887 = vsyncpa [#allocation3], 1 }
 0xa03   :  { %1889 = vsyncpa [#allocation3 + $0x1], 1 }

</bundles_post_ra>
